<compile_context>
chip_gen: v7x
topology: tpu7x:2x2x1
jax: 0.10.0
libtpu: 0.0.40
codegen_flags: <defaults>
</compile_context>

<pallas_src>
import functools

import jax
import jax.numpy as jnp
from jax.experimental import pallas as pl
from jax.experimental.pallas import tpu as pltpu


def _round_up(a, b):
    return (a + b - 1) // b * b


def _choose_tile(n_atoms, max_tile_n):
    """Pick (tile_n, n_tiles): tiles are multiples of 128 rows (lane-dense output
    stores), tile_n <= n_atoms (so blocks never exceed the array dim), an even
    tile count when >1 (v7x megacore balance), no wrapper-side padding."""
    if n_atoms < 512:
        return n_atoms, 1                      # single full-array block
    n_tiles = max(2, pl.cdiv(n_atoms, max_tile_n))
    if n_tiles % 2:
        n_tiles += 1                           # v7x: even split across the 2 TCs
    tile_n = min(max_tile_n, _round_up(pl.cdiv(n_atoms, n_tiles), 128))
    return tile_n, pl.cdiv(n_atoms, tile_n)


def _mlp_kernel(x_ref, w1t_ref, b1_ref, w2_ref, b2_ref, o_ref):
    """Dense -> SiLU -> matvec on one tile of atoms, atoms on the lane axis.

    x_ref:   (tile_n, n_in)      per-atom representation (producer dtype)
    w1t_ref: (n_hidden, n_in)    W1^T
    b1_ref:  (n_hidden, 1)
    w2_ref:  (n_hidden, 1)
    b2_ref:  (1, 1)
    o_ref:   (1, tile_n)         lane-dense output row
    """
    # Layer 1 on the MXU: h^T = W1^T @ x^T, expressed as A @ B^T (contract the
    # last dim of both operands — same pattern as q @ k^T).  f32 accumulation,
    # HIGHEST precision to match the f32 PyTorch module.
    ht = jax.lax.dot_general(
        w1t_ref[...], x_ref[...],
        dimension_numbers=(((1,), (1,)), ((), ())),
        preferred_element_type=jnp.float32,
        precision=jax.lax.Precision.HIGHEST,
    )                                                   # (n_hidden, tile_n)
    ht = ht + b1_ref[...]                               # broadcast over lanes
    ht = ht * jax.nn.sigmoid(ht)                        # SiLU: EUP sigmoid + VPU mul, lane-dense
    # Layer 2 (n_out == 1): VPU multiply + sublane reduce over n_hidden.  The
    # reduce runs over exactly n_hidden logical sublanes, so no padded-lane
    # leakage concern; the result is already (1, tile_n) lane-dense.
    y = jnp.sum(ht * w2_ref[...], axis=0, keepdims=True) + b2_ref[...]
    o_ref[...] = y.astype(o_ref.dtype)


@functools.partial(jax.jit, static_argnames=("max_tile_n",))
def diffusion_time_forward(x, w1, b1, w2, b2, *, max_tile_n=8192):
    """Pallas forward for DiffusionTime (aggregation_mode=None).

    Args:
      x:  (n_atoms, n_in) per-atom scalar representation (f32 or bf16; read
          directly from HBM, no wrapper-side cast/pad copy).
      w1: (n_in, n_hidden), b1: (n_hidden,)
      w2: (n_hidden, n_out), b2: (n_out,)    (n_out must be 1, the module default)
    Returns:
      t_pred: (n_atoms,)   (squeeze(-1) applied, matching the module).
    """
    n_atoms, n_in = x.shape
    n_hidden, n_out = w2.shape
    if n_out != 1:
        # TODO(synk): n_out > 1 not supported; layer 2 is specialized to a matvec.
        raise NotImplementedError("DiffusionTime kernel specialized to n_out == 1")

    tile_n, n_tiles = _choose_tile(n_atoms, max_tile_n)

    # Tiny weight reshapes (16x32-ish) — negligible, would be done once at load.
    w1t = jnp.transpose(w1).astype(x.dtype)             # (n_hidden, n_in)
    b1c = b1.reshape(n_hidden, 1).astype(jnp.float32)
    w2c = w2.reshape(n_hidden, 1).astype(jnp.float32)
    b2c = b2.reshape(1, 1).astype(jnp.float32)

    out = pl.pallas_call(
        _mlp_kernel,
        out_shape=jax.ShapeDtypeStruct((n_tiles, tile_n), x.dtype),
        grid_spec=pltpu.PrefetchScalarGridSpec(
            num_scalar_prefetch=0,
            grid=(n_tiles,),
            in_specs=[
                # per-atom representation: tiled over atoms; the ragged last tile
                # (n_tiles*tile_n > n_atoms) is fine — padded rows only produce
                # padded output columns, dropped by the final slice.
                pl.BlockSpec((tile_n, n_in), lambda i: (i, 0)),
                # small weights / biases: full arrays, resident in VMEM
                pl.BlockSpec((n_hidden, n_in), lambda i: (0, 0)),
                pl.BlockSpec((n_hidden, 1), lambda i: (0, 0)),
                pl.BlockSpec((n_hidden, 1), lambda i: (0, 0)),
                pl.BlockSpec((1, 1), lambda i: (0, 0)),
            ],
            # lane-dense: one (1, tile_n) row per grid step (unmasked vst)
            out_specs=pl.BlockSpec((1, tile_n), lambda i: (i, 0)),
        ),
        compiler_params=pltpu.CompilerParams(
            dimension_semantics=("parallel",),
            vmem_limit_bytes=32 * 1024 * 1024,
        ),
    )(x, w1t, b1c, w2c, b2c)

    # DiffusionTime: inputs[output_key] = out.squeeze(-1)  (aggregation_mode is None)
    # -> free reshape to 1-D and drop the ragged-tile padding.
    return out.reshape(n_tiles * tile_n)[:n_atoms]
    # TODO(synk): aggregation_mode != None (per-molecule segment sum/mean over idx_m)
    # and detach_representation (autograd detach) have no forward-kernel equivalent here.


def init_params(key, n_in, n_out=1):
    """Deterministic synthetic init matching schnetpack build_mlp shapes
    (n_layers=2, n_hidden=None -> single hidden layer of width n_in // 2)."""
    n_hidden = max(n_out, n_in // 2)
    k1, k2, k3, k4 = jax.random.split(key, 4)
    w1 = jax.random.normal(k1, (n_in, n_hidden), jnp.float32) / jnp.sqrt(n_in)
    b1 = jax.random.normal(k2, (n_hidden,), jnp.float32) * 0.01
    w2 = jax.random.normal(k3, (n_hidden, n_out), jnp.float32) / jnp.sqrt(n_hidden)
    b2 = jax.random.normal(k4, (n_out,), jnp.float32) * 0.01
    return w1, b1, w2, b2


def reference_forward(x, w1, b1, w2, b2):
    """Pure-f32 reference (PyTorch module semantics)."""
    h = jnp.dot(x, w1, precision=jax.lax.Precision.HIGHEST) + b1
    h = h * jax.nn.sigmoid(h)
    y = jnp.dot(h, w2, precision=jax.lax.Precision.HIGHEST) + b2
    return y[:, 0]


if __name__ == "__main__":
    key = jax.random.PRNGKey(0)
    kx, kp, kx2 = jax.random.split(key, 3)

    n_in, n_out = 32, 1
    w1, b1, w2, b2 = init_params(kp, n_in, n_out)

    # Small case: 64 atoms -> single full-array block.
    n_atoms = 64
    x = jax.random.normal(kx, (n_atoms, n_in), jnp.float32)
    t_pred = jax.block_until_ready(diffusion_time_forward(x, w1, b1, w2, b2))
    assert t_pred.shape == (n_atoms,)
    assert jnp.allclose(t_pred, reference_forward(x, w1, b1, w2, b2),
                        atol=1e-4, rtol=1e-4)

    # Larger, ragged atom count -> even multi-tile "parallel" grid, no wrapper pad.
    n_atoms2 = 2500
    x2 = jax.random.normal(kx2, (n_atoms2, n_in), jnp.float32)
    t2 = jax.block_until_ready(diffusion_time_forward(x2, w1, b1, w2, b2))
    assert t2.shape == (n_atoms2,)
    assert jnp.allclose(t2, reference_forward(x2, w1, b1, w2, b2),
                        atol=1e-4, rtol=1e-4)

    print("KERNEL_OK")
</pallas_src>

<mosaic_0001>
module attributes {stable_mosaic.version = 11 : i64} {
  func.func @_mlp_kernel(%arg0: i32, %arg1: memref<64x32xf32, #tpu.memory_space<vmem>>, %arg2: memref<16x32xf32, #tpu.memory_space<vmem>>, %arg3: memref<16x1xf32, #tpu.memory_space<vmem>>, %arg4: memref<16x1xf32, #tpu.memory_space<vmem>>, %arg5: memref<1x1xf32, #tpu.memory_space<vmem>>, %arg6: memref<1x64xf32, #tpu.memory_space<vmem>>) attributes {dimension_semantics = [#tpu.dimension_semantics<parallel>], iteration_bounds = array<i64: 1>, scalar_prefetch = 0 : i64, scratch_operands = 0 : i64, tpu.core_type = #tpu.core_type<tc>, window_params = [{transform_indices = @transform_0, window_bounds = array<i64: 64, 32>}, {pipeline_mode = #tpu.pipeline_mode<synchronous>, transform_indices = @transform_1, window_bounds = array<i64: 16, 32>}, {pipeline_mode = #tpu.pipeline_mode<synchronous>, transform_indices = @transform_2, window_bounds = array<i64: 16, 1>}, {pipeline_mode = #tpu.pipeline_mode<synchronous>, transform_indices = @transform_3, window_bounds = array<i64: 16, 1>}, {pipeline_mode = #tpu.pipeline_mode<synchronous>, transform_indices = @transform_4, window_bounds = array<i64: 1, 1>}, {transform_indices = @transform_5, window_bounds = array<i64: 1, 64>}]} {
    %c0 = arith.constant 0 : index
    %c0_0 = arith.constant 0 : index
    %0 = vector.load %arg2[%c0, %c0_0] : memref<16x32xf32, #tpu.memory_space<vmem>>, vector<16x32xf32>
    %c0_1 = arith.constant 0 : index
    %c0_2 = arith.constant 0 : index
    %1 = vector.load %arg1[%c0_1, %c0_2] : memref<64x32xf32, #tpu.memory_space<vmem>>, vector<64x32xf32>
    %cst = arith.constant dense<0.000000e+00> : vector<16x64xf32>
    %2 = tpu.matmul %0, %1, %cst {dimension_numbers = #tpu.dot_dimension_numbers<[1], [1], [0], [0], [0, 0, 1, 0], [], []>, precision = #tpu.contract_precision<fp32>} : vector<16x32xf32>, vector<64x32xf32>, vector<16x64xf32> -> vector<16x64xf32>
    %c0_3 = arith.constant 0 : index
    %c0_4 = arith.constant 0 : index
    %3 = vector.load %arg3[%c0_3, %c0_4] : memref<16x1xf32, #tpu.memory_space<vmem>>, vector<16x1xf32>
    %4 = vector.broadcast %3 : vector<16x1xf32> to vector<16x64xf32>
    %5 = arith.addf %2, %4 : vector<16x64xf32>
    %6 = arith.negf %5 : vector<16x64xf32>
    %7 = math.exp %6 : vector<16x64xf32>
    %cst_5 = arith.constant 1.000000e+00 : f32
    %8 = vector.broadcast %cst_5 : f32 to vector<16x64xf32>
    %9 = arith.addf %8, %7 : vector<16x64xf32>
    %10 = arith.divf %8, %9 : vector<16x64xf32>
    %11 = arith.mulf %5, %10 : vector<16x64xf32>
    %c0_6 = arith.constant 0 : index
    %c0_7 = arith.constant 0 : index
    %12 = vector.load %arg4[%c0_6, %c0_7] : memref<16x1xf32, #tpu.memory_space<vmem>>, vector<16x1xf32>
    %13 = vector.broadcast %12 : vector<16x1xf32> to vector<16x64xf32>
    %14 = arith.mulf %11, %13 : vector<16x64xf32>
    %cst_8 = arith.constant dense<0.000000e+00> : vector<64xf32>
    %15 = vector.multi_reduction <add>, %14, %cst_8 [0] : vector<16x64xf32> to vector<64xf32>
    %16 = vector.shape_cast %15 : vector<64xf32> to vector<1x64xf32>
    %c0_9 = arith.constant 0 : index
    %c0_10 = arith.constant 0 : index
    %17 = vector.load %arg5[%c0_9, %c0_10] : memref<1x1xf32, #tpu.memory_space<vmem>>, vector<1x1xf32>
    %18 = vector.broadcast %17 : vector<1x1xf32> to vector<1x64xf32>
    %19 = arith.addf %16, %18 : vector<1x64xf32>
    %c0_11 = arith.constant 0 : index
    %c0_12 = arith.constant 0 : index
    %20 = vector.load %arg6[%c0_11, %c0_12] : memref<1x64xf32, #tpu.memory_space<vmem>>, vector<1x64xf32>
    tpu.vector_store %arg6[%c0_11, %c0_12], %19 {strides = array<i32>} : memref<1x64xf32, #tpu.memory_space<vmem>>, vector<1x64xf32>,
    return
  }
  func.func @transform_0(%arg0: i32) -> (i32, i32) {
    %c0_i32 = arith.constant 0 : i32
    %c0_i32_0 = arith.constant 0 : i32
    return %arg0, %c0_i32 : i32, i32
  }
  func.func @transform_1(%arg0: i32) -> (i32, i32) {
    %c0_i32 = arith.constant 0 : i32
    %c0_i32_0 = arith.constant 0 : i32
    %c0_i32_1 = arith.constant 0 : i32
    return %c0_i32, %c0_i32_0 : i32, i32
  }
  func.func @transform_2(%arg0: i32) -> (i32, i32) {
    %c0_i32 = arith.constant 0 : i32
    %c0_i32_0 = arith.constant 0 : i32
    %c0_i32_1 = arith.constant 0 : i32
    return %c0_i32, %c0_i32_0 : i32, i32
  }
  func.func @transform_3(%arg0: i32) -> (i32, i32) {
    %c0_i32 = arith.constant 0 : i32
    %c0_i32_0 = arith.constant 0 : i32
    %c0_i32_1 = arith.constant 0 : i32
    return %c0_i32, %c0_i32_0 : i32, i32
  }
  func.func @transform_4(%arg0: i32) -> (i32, i32) {
    %c0_i32 = arith.constant 0 : i32
    %c0_i32_0 = arith.constant 0 : i32
    %c0_i32_1 = arith.constant 0 : i32
    return %c0_i32, %c0_i32_0 : i32, i32
  }
  func.func @transform_5(%arg0: i32) -> (i32, i32) {
    %c0_i32 = arith.constant 0 : i32
    %c0_i32_0 = arith.constant 0 : i32
    return %arg0, %c0_i32 : i32, i32
  }
}

</mosaic_0001>

<bundles_post_ra>
// kernel: diffusion_time_forward.1
= control target key start
LH: loop header
LB: loop body
LE: loop exit
PB: predicated region body
PF: predicated region fallthrough
CT: control target
= control target key end

     0   :  { %s1228_s0 = inlined_call_operand.vmem [shape: f32[64,32], index: 0, kind: input, shape index: {}]   ;;  %s1229_s1 = inlined_call_operand.vmem [shape: f32[16,32], index: 1, kind: input, shape index: {}]   ;;  %s1230_s2 = inlined_call_operand.vmem [shape: f32[16,1], index: 2, kind: input, shape index: {}]   ;;  %s1231_s3 = inlined_call_operand.vmem [shape: f32[16,1], index: 3, kind: input, shape index: {}]   ;;  %s1232_s4 = inlined_call_operand.<no memory space> [shape: f32[1,1], index: 4, kind: input, shape index: {}]   ;;  %s1233_s5 = inlined_call_operand.hbm [shape: f32[1,64], index: 5, kind: output, shape index: {}]  }
   0x1   :  { %v10_v0 = vstv %s1232_s4 }
   0x2   :  { %11 = vst [vmem:[#allocation2] sm:$0x1] %v10_v0 }
   0x3   :  { %v25_v1 = vld [vmem:[%s1228_s0] sm:$0xff]  ;;  %v26_v2 = vld [vmem:[%s1228_s0 + $0x8] sm:$0xff]  ;;  %vm45_vm0 = vcmask 261120   ;;  %v27_v3 = vld [vmem:[%s1228_s0 + $0x10] sm:$0xff]  ;;  %v1041_v8 = vmov 0  }
   0x4   :  { %v53_v4 = vsel %vm45_vm0, %v25_v1, 0  ;;  %v56_v5 = vsel %vm45_vm0, %v26_v2, 0  ;;  %v28_v6 = vld [vmem:[%s1228_s0 + $0x18] sm:$0xff]  ;;  %v1091_v7 = vsel %vm45_vm0, %v27_v3, 0  ;;  %1007 = vset.pattern.permute.xlu0 %v1041_v8  ;;  %1008 = vset.pattern.permute.xlu1 %v1041_v8  ;;  %v29_v13 = vld [vmem:[%s1228_s0 + $0x20] sm:$0xff]  ;;  %v30_v14 = vld [vmem:[%s1228_s0 + $0x28] sm:$0xff] }
   0x5   :  { %v77_v9 = vand.u32 4294901760, %v53_v4  ;;  %v80_v10 = vand.u32 4294901760, %v56_v5  ;;  %v62_v11 = vsel %vm45_vm0, %v28_v6, 0  ;;  %v83_v12 = vand.u32 4294901760, %v1091_v7  ;;  %v23_v16 = vld [vmem:[%s1229_s1] sm:$0xff]  ;;  %v34_v25 = vld [vmem:[%s1230_s2 + $0x8] sm:$0xff] }
   0x6   :  { %v86_v15 = vand.u32 4294901760, %v62_v11  ;;  %v33_v18 = vld [vmem:[%s1230_s2] sm:$0xff]  ;;  %v65_v21 = vsel %vm45_vm0, %v29_v13, 0  ;;  %v68_v22 = vsel %vm45_vm0, %v30_v14, 0  ;;  %v47_v23 = vsel %vm45_vm0, %v23_v16, 0  ;;  %v671_v26 = vld [vmem:[%s1231_s3 + $0x8] sm:$0xff] }
   0x7   :  { %v1104_v17 = vpack.c.bf16 %v80_v10, %v77_v9  ;;  %v670_v19 = vld [vmem:[%s1231_s3] sm:$0xff]  ;;  %37 = vperm.xlu0 %1007, %v33_v18   ;;  %v1119_v24 = vand.u32 4294901760, %v47_v23 }
   0x8   :  { %v1112_v20 = vpack.c.bf16 %v86_v15, %v83_v12  ;;  %674 = vperm.xlu1 %1008, %v670_v19  }
   0x9   :  { %898 = vmatprep.subr.bf16.mxu1 %v1104_v17  ;;  %946 = vmatprep.subr.bf16.mxu0 %v1104_v17 }
   0xa   :  { %12 = vsyncpa [#allocation4], 0  ;;  %900 = vmatpush3.bf16.xpose.msra.mxu1 %v1104_v17  ;;  %948 = vmatpush3.bf16.xpose.msra.mxu0 %v1104_v17  ;;  %v89_v27 = vand.u32 4294901760, %v65_v21  ;;  %v92_v28 = vand.u32 4294901760, %v68_v22  ;;  %v31_v29 = vld [vmem:[%s1228_s0 + $0x30] sm:$0xff]  ;;  %v32_v30 = vld [vmem:[%s1228_s0 + $0x38] sm:$0xff]  ;;  %v1138_v31 = vsub.f32 %v47_v23, %v1119_v24  ;;  %v1146_v38 = vsub.f32 %v53_v4, %v77_v9 }
   0xb   :  { %902 = vmatprep.subr.bf16.mxu1 %v1112_v20  ;;  %950 = vmatprep.subr.bf16.mxu0 %v1112_v20  ;;  %v694_v33 = vld [vmem:[#allocation2] sm:$0x1]  ;;  %v71_v34 = vsel %vm45_vm0, %v31_v29, 0  ;;  %v74_v35 = vsel %vm45_vm0, %v32_v30, 0  ;;  %v1148_v39 = vsub.f32 %v56_v5, %v80_v10  ;;  %v24_v40 = vld [vmem:[%s1229_s1 + $0x8] sm:$0xff]  ;;  %v1167_v51 = vsub.f32 %v1091_v7, %v83_v12  ;;  %s1042_s1 = smov [#allocation3]  }
   0xc   :  { %42 = vperm.xlu0 %1007, %v34_v25   ;;  %679 = vperm.xlu1 %1008, %v671_v26   ;;  %v151_v32 = vand.u32 4294901760, %v1138_v31  ;;  %v1143_v36 = vpack.c.bf16 %v92_v28, %v89_v27  ;;  %v95_v42 = vand.u32 4294901760, %v71_v34  ;;  %v98_v43 = vand.u32 4294901760, %v74_v35  ;;  %s713_s19 = sshll.u32 %s1042_s1, 4  ;;  %s714_s19 = int_to_ptr.vmem [resolvable:$true] %s713_s19 }
   0xd   :  { %v50_v44 = vsel %vm45_vm0, %v24_v40, 0  ;;  %v172_v45 = vand.u32 4294901760, %v1146_v38  ;;  %v179_v46 = vand.u32 4294901760, %v1148_v39  ;;  %v1169_v52 = vsub.f32 %v62_v11, %v86_v15  ;;  %s1017_s20 = scalar_lea.vmem %s714_s19, 16  ;;  %s1021_s21 = scalar_lea.vmem %s714_s19, 32 }
   0xe   :  { %v152_v37 = vsub.f32 %v1138_v31, %v151_v32  ;;  %856 = vmatprep.mubr.f32.mxu0 %v151_v32  ;;  %v1160_v47 = vand.u32 4294901760, %v50_v44  ;;  %v1162_v48 = vpack.c.bf16 %v98_v43, %v95_v42  ;;  %v186_v56 = vand.u32 4294901760, %v1167_v51  ;;  %p1018_p0 = scmp.ne.s32.totalorder %s714_s19, %s1017_s20  ;;  %p1022_p1 = scmp.lt.s32.totalorder %s714_s19, %s714_s19 }
   0xf   :  { %v173_v49 = vsub.f32 %v1146_v38, %v172_v45  ;;  %v180_v50 = vsub.f32 %v1148_v39, %v179_v46  ;;  %v193_v57 = vand.u32 4294901760, %v1169_v52  ;;  %v1181_v59 = vsub.f32 %v65_v21, %v89_v27  ;;  %p1023_p2 = scmp.lt.s32.totalorder %s1021_s21, %s1017_s20 }
  0x10   :  { %697 = vperm.xlu0 %1007, %v694_v33   ;;  %v153_v41 = vand.u32 4294901760, %v152_v37  ;;  %v1172_v53 = vsub.f32 %v50_v44, %v1160_v47  ;;  %v1183_v60 = vsub.f32 %v68_v22, %v92_v28  ;;  %v961_v62 = vpack.c.bf16 %v179_v46, %v172_v45 }
  0x11   :  { %v174_v54 = vand.u32 4294901760, %v173_v49  ;;  %v181_v55 = vand.u32 4294901760, %v180_v50  ;;  %v187_v63 = vsub.f32 %v1167_v51, %v186_v56  ;;  %v194_v0 = vsub.f32 %v1169_v52, %v193_v57  ;;  %p1024_p3 = por %p1023_p2, %p1022_p1 }
  0x12   :  { %904 = vmatpush3.bf16.xpose.msra.mxu1 %v1112_v20  ;;  %952 = vmatpush3.bf16.xpose.msra.mxu0 %v1112_v20  ;;  %v161_v58 = vand.u32 4294901760, %v1172_v53  ;;  %v200_v2 = vand.u32 4294901760, %v1181_v59  ;;  %v207_v5 = vand.u32 4294901760, %v1183_v60  ;;  %v965_v7 = vpack.c.bf16 %v193_v57, %v186_v56 }
  0x13   :  { %906 = vmatprep.subr.bf16.mxu1 %v1143_v36  ;;  %954 = vmatprep.subr.bf16.mxu0 %v1143_v36  ;;  %v913_v61 = vpack.c.bf16 %v181_v55, %v174_v54  ;;  %v188_v3 = vand.u32 4294901760, %v187_v63  ;;  %v195_v4 = vand.u32 4294901760, %v194_v0  ;;  %v213_v11 = vsub.f32 %v71_v34, %v95_v42  ;;  %p1025_p4 = pnand %p1024_p3, %p1018_p0 }
  0x14   :  { %799 = vmatprep.mubr.f32.mxu1 %v153_v41  ;;  %v162_v1 = vsub.f32 %v1172_v53, %v161_v58  ;;  %v201_v8 = vsub.f32 %v1181_v59, %v200_v2  ;;  %v208_v10 = vsub.f32 %v1183_v60, %v207_v5  ;;  %v220_v12 = vsub.f32 %v74_v35, %v98_v43 }
  0x15   :  { %v917_v9 = vpack.c.bf16 %v195_v4, %v188_v3  ;;  %v214_v15 = vand.u32 4294901760, %v213_v11  ;;  %v969_v19 = vpack.c.bf16 %v207_v5, %v200_v2  ;;  %v929_v28 = vpack.c.bf16 %v1148_v39, %v1146_v38 }
  0x16   :  { %v163_v6 = vand.u32 4294901760, %v162_v1  ;;  %v202_v13 = vand.u32 4294901760, %v201_v8  ;;  %v209_v14 = vand.u32 4294901760, %v208_v10  ;;  %v221_v16 = vand.u32 4294901760, %v220_v12 }
  0x17   :  { %v215_v21 = vsub.f32 %v213_v11, %v214_v15  ;;  %v933_v29 = vpack.c.bf16 %v1169_v52, %v1167_v51  ;;  %v937_v30 = vpack.c.bf16 %v1183_v60, %v1181_v59  ;;  %v941_v32 = vpack.c.bf16 %v220_v12, %v213_v11 }
  0x18   :  { %v921_v18 = vpack.c.bf16 %v209_v14, %v202_v13  ;;  %v222_v22 = vsub.f32 %v220_v12, %v221_v16  ;;  %v973_v27 = vpack.c.bf16 %v221_v16, %v214_v15  ;;  %vm684_vm1 = vcmask 523264  }
  0x19   :  { %v216_v23 = vand.u32 4294901760, %v215_v21  ;;  %v700_v55 = vlaneseq  ;;  %vm705_vm2 = vcmask 516096  }
  0x1a   :  { %908 = vmatpush3.bf16.xpose.msra.mxu1 %v1143_v36  ;;  %956 = vmatpush3.bf16.xpose.msra.mxu0 %v1143_v36  ;;  %v223_v25 = vand.u32 4294901760, %v222_v22 }
  0x1b   :  { %910 = vmatprep.subr.bf16.mxu1 %v1162_v48  ;;  %958 = vmatprep.subr.bf16.mxu0 %v1162_v48 }
  0x1c   :  { %v925_v26 = vpack.c.bf16 %v223_v25, %v216_v23 }
  0x22   :  { %912 = vmatpush3.bf16.xpose.msra.mxu1 %v1162_v48  ;;  %960 = vmatpush3.bf16.xpose.msra.mxu0 %v1162_v48 }
  0x23   :  { %914 = vmatprep.subr.bf16.mxu1 %v913_v61  ;;  %962 = vmatprep.subr.bf16.mxu0 %v961_v62 }
  0x29   :  { %800 = vmatmul.mubr.f32.vlgmr.msra.gmra.mrb[0].mxu1 %v163_v6  ;;  %857 = vmatmul.mubr.f32.vlgmr.msra.gmra.mrb[0].mxu0 %v161_v58  ;;  %v701_v58 = vshrl.u32 %v700_v55, 7 }
  0x2a   :  { %916 = vmatpush3.bf16.xpose.msra.mxu1 %v913_v61  ;;  %964 = vmatpush3.bf16.xpose.msra.mxu0 %v961_v62 }
  0x2b   :  { %918 = vmatprep.subr.bf16.mxu1 %v917_v9  ;;  %966 = vmatprep.subr.bf16.mxu0 %v965_v7  ;;  %v702_v61 = vsub.s32 0, %v701_v58 }
  0x2c   :  { %818 = vmatprep.mubr.f32.mxu1 %v1119_v24  ;;  %875 = vmatprep.mubr.f32.mxu0 %v1119_v24 }
  0x32   :  { %920 = vmatpush3.bf16.xpose.msra.mxu1 %v917_v9  ;;  %968 = vmatpush3.bf16.xpose.msra.mxu0 %v965_v7 }
  0x33   :  { %922 = vmatprep.subr.bf16.mxu1 %v921_v18  ;;  %970 = vmatprep.subr.bf16.mxu0 %v969_v19 }
  0x3a   :  { %924 = vmatpush3.bf16.xpose.msra.mxu1 %v921_v18  ;;  %972 = vmatpush3.bf16.xpose.msra.mxu0 %v969_v19 }
  0x3b   :  { %926 = vmatprep.subr.bf16.mxu1 %v925_v26  ;;  %974 = vmatprep.subr.bf16.mxu0 %v973_v27 }
  0x42   :  { %928 = vmatpush3.bf16.xpose.msra.mxu1 %v925_v26  ;;  %976 = vmatpush3.bf16.xpose.msra.mxu0 %v973_v27 }
  0x43   :  { %930 = vmatprep.subr.bf16.mxu1 %v929_v28  ;;  %978 = vmatprep.subr.bf16.mxu0 %v1104_v17 }
  0x49   :  { %819 = vmatmul.mubr.f32.vlgmr.msra.gmra.mrb[0].mxu1 %v1160_v47  ;;  %876 = vmatmul.mubr.f32.vlgmr.msra.gmra.mrb[0].mxu0 %v1160_v47 }
  0x4a   :  { %932 = vmatpush3.bf16.xpose.msra.mxu1 %v929_v28  ;;  %980 = vmatpush3.bf16.xpose.msra.mxu0 %v1104_v17 }
  0x4b   :  { %934 = vmatprep.subr.bf16.mxu1 %v933_v29  ;;  %982 = vmatprep.subr.bf16.mxu0 %v1112_v20 }
  0x4c   :  { %837 = vmatprep.mubr.f32.mxu1 %v1138_v31  ;;  %894 = vmatprep.mubr.f32.mxu0 %v1119_v24 }
  0x52   :  { %936 = vmatpush3.bf16.xpose.msra.mxu1 %v933_v29  ;;  %984 = vmatpush3.bf16.xpose.msra.mxu0 %v1112_v20 }
  0x53   :  { %938 = vmatprep.subr.bf16.mxu1 %v937_v30  ;;  %986 = vmatprep.subr.bf16.mxu0 %v1143_v36 }
  0x5a   :  { %940 = vmatpush3.bf16.xpose.msra.mxu1 %v937_v30  ;;  %988 = vmatpush3.bf16.xpose.msra.mxu0 %v1143_v36 }
  0x5b   :  { %942 = vmatprep.subr.bf16.mxu1 %v941_v32  ;;  %990 = vmatprep.subr.bf16.mxu0 %v1162_v48 }
  0x62   :  { %944 = vmatpush3.bf16.xpose.msra.mxu1 %v941_v32  ;;  %992 = vmatpush3.bf16.xpose.msra.mxu0 %v1162_v48 }
  0x69   :  { %838 = vmatmul.mubr.f32.vlgmr.msra.gmra.mrb[0].mxu1 %v1172_v53  ;;  %895 = vmatmul.mubr.f32.vlgmr.msra.gmra.mrb[0].mxu0 %v1160_v47 }
  0x86   :  { %v38_v17 = vpop.permute.xlu0 %37 }
  0x87   :  { %v675_v45 = vpop.permute.xlu1 %674 }
  0x8b   :  { %v43_v24 = vpop.permute.xlu0 %42  ;;  %v680_v50 = vpop.permute.xlu1 %679 }
  0x8f   :  { %v698_v63 = vpop.permute.xlu0 %697 }
  0x90   :  { %v703_v1 = vrot.slane %v698_v63, %v702_v61 }
 0x13c   :  { %v839_v20 = vpop.f32.mrb[0].mxu1  ;;  %v896_v31 = vpop.f32.mrb[0].mxu0 }
 0x13d   :  { %v993_v33 = vadd.f32 %v839_v20, %v43_v24  ;;  %v370_v34 = vpop.f32.mrb[1].mxu1  ;;  %v646_v35 = vpop.f32.mrb[1].mxu0 }
 0x13e   :  { %v995_v37 = vadd.f32 %v370_v34, %v38_v17 }
 0x13f   :  { %v994_v38 = vadd.f32 %v993_v33, %v896_v31 }
 0x140   :  { %v996_v36 = vadd.f32 %v995_v37, %v646_v35 }
 0x141   :  { %v722_v39 = vmul.f32 -1.442695, %v994_v38 }
 0x142   :  { %v721_v40 = vmul.f32 -1.442695, %v996_v36 }
 0x143   :  { %1009 = vpow2.f32 %v722_v39 }
 0x144   :  { %1011 = vpow2.f32 %v721_v40 }
 0x14d   :  { %v1010_v41 = vpop.eup %1009 }
 0x14e   :  { %v1012_v42 = vpop.eup %1011  ;;  %v663_v43 = vadd.f32 1.0, %v1010_v41 }
 0x14f   :  { %v662_v44 = vadd.f32 1.0, %v1012_v42 }
 0x150   :  { %1013 = vrcp.f32 %v663_v43 }
 0x151   :  { %1015 = vrcp.f32 %v662_v44 }
 0x15a   :  { %v1014_v46 = vpop.eup %1013 }
 0x15b   :  { %v1016_v47 = vpop.eup %1015  ;;  %v669_v48 = vmul.f32 %v1014_v46, %v994_v38 }
 0x15c   :  { %v668_v49 = vmul.f32 %v1016_v47, %v996_v36 }
 0x15d   :  { %v683_v51 = vmul.f32 %v680_v50, %v669_v48 }
 0x15e   :  { %v682_v52 = vmul.f32 %v675_v45, %v668_v49 }
 0x15f   :  { %v686_v53 = vsel %vm684_vm1, %v683_v51, 0.0 }
 0x160   :  { %v685_v54 = vsel %vm684_vm1, %v682_v52, 0.0 }
 0x161   :  { %v687_v56 = vadd.f32 %v686_v53, %v685_v54 }
 0x163   :  { %v688_v57 = vrot.slane %v687_v56, 4 }
 0x165   :  { %v689_v59 = vadd.f32 %v688_v57, %v687_v56 }
 0x167   :  { %v690_v60 = vrot.slane %v689_v59, 2 }
 0x169   :  { %v691_v62 = vadd.f32 %v690_v60, %v689_v59 }
 0x16b   :  { %v692_v0 = vrot.slane %v691_v62, 1 }
 0x16d   :  { %v693_v2 = vadd.f32 %v692_v0, %v691_v62 }
 0x16f   :  { %v704_v3 = vadd.f32 %v703_v1, %v693_v2 }
 0x171   :  { %706 = vst.msk [vmem:[#allocation3] sm:$0x1] %vm705_vm2, %v704_v3 }
 0x172   :  { %1028 = shalt.err (!%p1025_p4)
}
 0x173   :  { %s1029_s24 = scalar_lea.hbm %s1233_s5, 16 }
 0x174   :  { %p1030_p5 = scmp.ne.s32.totalorder %s1233_s5, %s1029_s24  ;;  %p1033_p6 = scmp.lt.u32.totalorder %s1029_s24, %s1233_s5 }
 0x176   :  { %p1035_p7 = pnand %p1033_p6, %p1030_p5 }
 0x178   :  { %1038 = shalt.err (!%p1035_p7)
}
 0x179   :  { %716 = dma.vmem_to_hbm [thread:$0]  %s714_s19, 16, %s1233_s5, [#allocation4]  }
 0x17a   :  { %1039 = dma.done.wait [#allocation4], 16  }
 0x17b   :  { %1040 = vsyncadd [#allocation4], 4294967280 }
 0x17c   :  { %720 = vsyncpa [#allocation4], 1 }

</bundles_post_ra>
